<compile_context>
chip_gen: v5e
topology: v5e:2x2
jax: 0.10.0
libtpu: 0.0.40
codegen_flags: <defaults>
</compile_context>

<pallas_src>
import functools

import jax
import jax.numpy as jnp
from jax.experimental import pallas as pl
from jax.experimental.pallas import tpu as pltpu


# ----------------------------- Pallas kernel -------------------------------

def _spmm_matmul_kernel(a_ref, x_ref, o_ref, acc_ref):
    # Grid: (M tiles, F tiles, K tiles).  K (adjacency columns) is the
    # reduction axis, runs last and is marked "arbitrary".
    @pl.when(pl.program_id(2) == 0)
    def _init():
        acc_ref[...] = jnp.zeros_like(acc_ref)

    acc_ref[...] += jnp.dot(
        a_ref[...], x_ref[...], preferred_element_type=jnp.float32
    )

    @pl.when(pl.program_id(2) == pl.num_programs(2) - 1)
    def _finalize():
        o_ref[...] = acc_ref[...].astype(o_ref.dtype)


def _round_up(v, m):
    return ((v + m - 1) // m) * m


def _pick_tile(dim, max_tile=512):
    # dim is always a multiple of 128 here; pick the largest tile (<= max_tile)
    # that divides it.  512-wide bf16/f32 tiles double-buffered stay well under
    # the default scoped VMEM on all generations (v5e/v6e/v7x, incl. 64 MiB v7x).
    for t in (max_tile, 384, 256, 128):
        if t <= dim and dim % t == 0:
            return t
    return dim


def _tiled_matmul(a, x, out_dtype=jnp.float32):
    """Tiled (M,K) @ (K,F) matmul on the MXU with f32 accumulation."""
    m, k = a.shape
    k2, f = x.shape
    assert k == k2
    tm = _pick_tile(m)
    tk = _pick_tile(k)
    tn = _pick_tile(f)
    grid = (m // tm, f // tn, k // tk)

    bytes_accessed = (
        a.size * a.dtype.itemsize
        + x.size * x.dtype.itemsize
        + m * f * jnp.dtype(out_dtype).itemsize
    )
    cost = pl.CostEstimate(
        flops=2 * m * k * f, transcendentals=0, bytes_accessed=bytes_accessed
    )

    return pl.pallas_call(
        _spmm_matmul_kernel,
        out_shape=jax.ShapeDtypeStruct((m, f), out_dtype),
        grid_spec=pltpu.PrefetchScalarGridSpec(
            num_scalar_prefetch=0,
            grid=grid,
            in_specs=[
                pl.BlockSpec((tm, tk), lambda i, j, kk: (i, kk)),
                pl.BlockSpec((tk, tn), lambda i, j, kk: (kk, j)),
            ],
            out_specs=pl.BlockSpec((tm, tn), lambda i, j, kk: (i, j)),
            scratch_shapes=[pltpu.VMEM((tm, tn), jnp.float32)],
        ),
        compiler_params=pltpu.CompilerParams(
            dimension_semantics=("parallel", "parallel", "arbitrary"),
            vmem_limit_bytes=32 * 1024 * 1024,
        ),
        cost_estimate=cost,
    )(a, x)


# ----------------------------- forward wrapper ------------------------------

@functools.partial(jax.jit, static_argnames=("num_nodes", "use_bf16"))
def gcn_layer_forward(adj_indices, adj_values, num_nodes, x, *, use_bf16=True):
    """Equivalent of torch_sparse.spmm(indices, values, N, N, x).

    adj_indices: int32 [2, nnz]  (row, col)
    adj_values:  float32 [nnz]
    x:           float32 [N, F]
    returns:     float32 [N, F] = A_dense @ x  (duplicates accumulate, as spmm)
    """
    n, f = x.shape
    assert n == num_nodes

    # TODO(synk): a true gather-based sparse SpMM (COO scalar-prefetched into
    # SMEM + row gather of X) would avoid materializing the dense N x N
    # adjacency entirely; here we densify in JAX glue (scatter-add preserves
    # torch_sparse.spmm duplicate-accumulation semantics) and run a tiled
    # dense A @ X on the MXU.
    a_dense = jnp.zeros((num_nodes, num_nodes), dtype=jnp.float32)
    a_dense = a_dense.at[adj_indices[0], adj_indices[1]].add(adj_values)

    # Pad to multiples of 128 so every block is (8,128)-aligned and the output
    # last dim is lane-dense (unmasked vst).  Zero padding is exact: padded K
    # columns of A hit zero rows of X; padded M rows / F cols are sliced off.
    n_pad = _round_up(num_nodes, 128)
    f_pad = _round_up(f, 128)
    a_p = jnp.pad(a_dense, ((0, n_pad - n), (0, n_pad - n)))
    x_p = jnp.pad(x, ((0, n_pad - n), (0, f_pad - f)))

    in_dtype = jnp.bfloat16 if use_bf16 else x_p.dtype
    out = _tiled_matmul(
        a_p.astype(in_dtype), x_p.astype(in_dtype), out_dtype=jnp.float32
    )
    return out[:n, :f].astype(x.dtype)


# ----------------------------- parameter setup -----------------------------

def init_gcn_layer_params(key, in_features, out_features):
    # Mirrors torch.nn.Linear(in_features, out_features) init shapes.
    # NOTE: these parameters are NOT used in forward (the PyTorch forward
    # never calls self.linear); initialized-but-unused for fidelity.
    kw, kb = jax.random.split(key)
    bound = 1.0 / (in_features ** 0.5)
    weight = jax.random.uniform(
        kw, (out_features, in_features), jnp.float32, -bound, bound
    )
    bias = jax.random.uniform(kb, (out_features,), jnp.float32, -bound, bound)
    return {"weight": weight, "bias": bias}


# ------------------------------ test helpers --------------------------------

def _make_graph(key, num_nodes):
    # Deterministic sparse adjacency: self-loops + a ring (both directions).
    rows = jnp.concatenate([
        jnp.arange(num_nodes),                       # self loops
        jnp.arange(num_nodes),                       # i -> i+1
        jnp.arange(num_nodes),                       # i -> i-1
    ])
    cols = jnp.concatenate([
        jnp.arange(num_nodes),
        (jnp.arange(num_nodes) + 1) % num_nodes,
        (jnp.arange(num_nodes) - 1) % num_nodes,
    ])
    adj_indices = jnp.stack([rows, cols]).astype(jnp.int32)      # [2, nnz]
    adj_values = jax.random.uniform(key, (adj_indices.shape[1],), jnp.float32)
    return adj_indices, adj_values


def _reference(adj_indices, adj_values, num_nodes, x, use_bf16=True):
    a_dense = jnp.zeros((num_nodes, num_nodes), jnp.float32)
    a_dense = a_dense.at[adj_indices[0], adj_indices[1]].add(adj_values)
    if use_bf16:
        a_dense = a_dense.astype(jnp.bfloat16).astype(jnp.float32)
        x = x.astype(jnp.bfloat16).astype(jnp.float32)
    return a_dense @ x


# --------------------------------- main -------------------------------------

if __name__ == "__main__":
    key = jax.random.PRNGKey(0)
    k1, k2, k3, k4, k_p = jax.random.split(key, 5)

    # Unused (per reference forward) linear params, initialized deterministically.
    params = init_gcn_layer_params(k_p, 32, 32)

    # Case 1: shapes implied by the module demo (areNum=16, in_features=32).
    n1, f1 = 16, 32
    x1 = jax.random.uniform(k1, (n1, f1), jnp.float32)
    idx1, val1 = _make_graph(k2, n1)
    out1 = jax.block_until_ready(gcn_layer_forward(idx1, val1, n1, x1))
    ref1 = _reference(idx1, val1, n1, x1)
    assert out1.shape == (n1, f1)
    assert jnp.allclose(out1, ref1, atol=2e-3, rtol=2e-3), "case1 mismatch"

    # Case 2: larger ragged shape to exercise padding + multi-tile K-reduction.
    n2, f2 = 300, 96
    x2 = jax.random.uniform(k3, (n2, f2), jnp.float32)
    idx2, val2 = _make_graph(k4, n2)
    out2 = jax.block_until_ready(gcn_layer_forward(idx2, val2, n2, x2))
    ref2 = _reference(idx2, val2, n2, x2)
    assert out2.shape == (n2, f2)
    assert jnp.allclose(out2, ref2, atol=2e-3, rtol=2e-3), "case2 mismatch"

    # Loose sanity check against full-f32 math (bf16 inputs round).
    ref2_f32 = _reference(idx2, val2, n2, x2, use_bf16=False)
    assert jnp.allclose(out2, ref2_f32, atol=5e-2, rtol=5e-2), "f32 sanity"

    print("KERNEL_OK")
</pallas_src>

<mosaic_0001>
module attributes {stable_mosaic.version = 11 : i64} {
  func.func @_spmm_matmul_kernel(%arg0: i32, %arg1: i32, %arg2: i32, %arg3: memref<128x128xbf16, #tpu.memory_space<vmem>>, %arg4: memref<128x128xbf16, #tpu.memory_space<vmem>>, %arg5: memref<128x128xf32, #tpu.memory_space<vmem>>, %arg6: memref<128x128xf32, #tpu.memory_space<vmem>>) attributes {dimension_semantics = [#tpu.dimension_semantics<parallel>, #tpu.dimension_semantics<parallel>, #tpu.dimension_semantics<arbitrary>], iteration_bounds = array<i64: 1, 1, 1>, scalar_prefetch = 0 : i64, scratch_operands = 1 : i64, tpu.core_type = #tpu.core_type<tc>, window_params = [{transform_indices = @transform_0, window_bounds = array<i64: 128, 128>}, {transform_indices = @transform_1, window_bounds = array<i64: 128, 128>}, {transform_indices = @transform_2, window_bounds = array<i64: 128, 128>}]} {
    %c0_i32 = arith.constant 0 : i32
    %0 = arith.cmpi eq, %arg2, %c0_i32 : i32
    %1 = arith.extui %0 : i1 to i32
    %c0_i32_0 = arith.constant 0 : i32
    %2 = arith.cmpi ne, %1, %c0_i32_0 : i32
    scf.if %2 {
      %cst_10 = arith.constant 0.000000e+00 : f32
      %12 = vector.broadcast %cst_10 : f32 to vector<128x128xf32>
      %c0_11 = arith.constant 0 : index
      %c0_12 = arith.constant 0 : index
      %13 = vector.load %arg6[%c0_11, %c0_12] : memref<128x128xf32, #tpu.memory_space<vmem>>, vector<128x128xf32>
      tpu.vector_store %arg6[%c0_11, %c0_12], %12 {strides = array<i32>} : memref<128x128xf32, #tpu.memory_space<vmem>>, vector<128x128xf32>,
    } else {
    }
    %c0 = arith.constant 0 : index
    %c0_1 = arith.constant 0 : index
    %3 = vector.load %arg6[%c0, %c0_1] : memref<128x128xf32, #tpu.memory_space<vmem>>, vector<128x128xf32>
    %c0_2 = arith.constant 0 : index
    %c0_3 = arith.constant 0 : index
    %4 = vector.load %arg3[%c0_2, %c0_3] : memref<128x128xbf16, #tpu.memory_space<vmem>>, vector<128x128xbf16>
    %c0_4 = arith.constant 0 : index
    %c0_5 = arith.constant 0 : index
    %5 = vector.load %arg4[%c0_4, %c0_5] : memref<128x128xbf16, #tpu.memory_space<vmem>>, vector<128x128xbf16>
    %cst = arith.constant dense<0.000000e+00> : vector<128x128xf32>
    %6 = tpu.matmul %4, %5, %cst {dimension_numbers = #tpu.dot_dimension_numbers<[1], [0], [0], [1], [0, 0, 1, 1], [], []>} : vector<128x128xbf16>, vector<128x128xbf16>, vector<128x128xf32> -> vector<128x128xf32>
    %7 = arith.addf %3, %6 : vector<128x128xf32>
    %c0_6 = arith.constant 0 : index
    %c0_7 = arith.constant 0 : index
    %8 = vector.load %arg6[%c0_6, %c0_7] : memref<128x128xf32, #tpu.memory_space<vmem>>, vector<128x128xf32>
    tpu.vector_store %arg6[%c0_6, %c0_7], %7 {strides = array<i32>} : memref<128x128xf32, #tpu.memory_space<vmem>>, vector<128x128xf32>,
    %c0_i32_8 = arith.constant 0 : i32
    %9 = arith.cmpi eq, %arg2, %c0_i32_8 : i32
    %10 = arith.extui %9 : i1 to i32
    %c0_i32_9 = arith.constant 0 : i32
    %11 = arith.cmpi ne, %10, %c0_i32_9 : i32
    scf.if %11 {
      %c0_10 = arith.constant 0 : index
      %c0_11 = arith.constant 0 : index
      %12 = vector.load %arg6[%c0_10, %c0_11] : memref<128x128xf32, #tpu.memory_space<vmem>>, vector<128x128xf32>
      %c0_12 = arith.constant 0 : index
      %c0_13 = arith.constant 0 : index
      %13 = vector.load %arg5[%c0_12, %c0_13] : memref<128x128xf32, #tpu.memory_space<vmem>>, vector<128x128xf32>
      tpu.vector_store %arg5[%c0_12, %c0_13], %12 {strides = array<i32>} : memref<128x128xf32, #tpu.memory_space<vmem>>, vector<128x128xf32>,
    } else {
    }
    return
  }
  func.func @transform_0(%arg0: i32, %arg1: i32, %arg2: i32) -> (i32, i32) {
    %c0_i32 = arith.constant 0 : i32
    return %arg0, %arg2 : i32, i32
  }
  func.func @transform_1(%arg0: i32, %arg1: i32, %arg2: i32) -> (i32, i32) {
    %c0_i32 = arith.constant 0 : i32
    return %arg2, %arg1 : i32, i32
  }
  func.func @transform_2(%arg0: i32, %arg1: i32, %arg2: i32) -> (i32, i32) {
    %c0_i32 = arith.constant 0 : i32
    return %arg0, %arg1 : i32, i32
  }
}

</mosaic_0001>

<bundles_post_ra>
// kernel: gcn_layer_forward.1
= control target key start
LH: loop header
LB: loop body
LE: loop exit
PB: predicated region body
PF: predicated region fallthrough
CT: control target
= control target key end

     0   :  { %s510_s1 = inlined_call_operand.vmem [shape: bf16[128,128], index: 1, kind: input, shape index: {}]   ;;  %s511_s0 = inlined_call_operand.vmem [shape: bf16[128,128], index: 0, kind: input, shape index: {}]   ;;  %s512_s2 = inlined_call_operand.vmem [shape: f32[128,128], index: 2, kind: output, shape index: {}]  }
   0x1   :  { %v374_v0 = vld [vmem:[%s510_s1 + $0x38] sm:$0xff]  ;;  %v373_v1 = vld [vmem:[%s510_s1 + $0x30] sm:$0xff]  ;;  %v372_v2 = vld [vmem:[%s510_s1 + $0x28] sm:$0xff] }
   0x2   :  { %175 = vmatpush.bf16.msra.mxu0 %v374_v0  ;;  %375 = vmatpush.bf16.msra.mxu1 %v374_v0  ;;  %v371_v3 = vld [vmem:[%s510_s1 + $0x20] sm:$0xff]  ;;  %v370_v4 = vld [vmem:[%s510_s1 + $0x18] sm:$0xff]  ;;  %v369_v5 = vld [vmem:[%s510_s1 + $0x10] sm:$0xff] }
   0x3   :  { %376 = vmatpush.bf16.msra.mxu2 %v374_v0  ;;  %377 = vmatpush.bf16.msra.mxu3 %v374_v0  ;;  %v368_v6 = vld [vmem:[%s510_s1 + $0x8] sm:$0xff]  ;;  %v367_v7 = vld [vmem:[%s510_s1] sm:$0xff]  ;;  %v361_v9 = vld [vmem:[%s511_s0 + $0x10] sm:$0xff] }
   0x4   :  { %v359_v8 = vld [vmem:[%s511_s0] sm:$0xff]  ;;  %v365_v11 = vld [vmem:[%s511_s0 + $0x30] sm:$0xff]  ;;  %v360_v12 = vld [vmem:[%s511_s0 + $0x8] sm:$0xff] }
   0x5   :  { %v363_v10 = vld [vmem:[%s511_s0 + $0x20] sm:$0xff]  ;;  %v362_v13 = vld [vmem:[%s511_s0 + $0x18] sm:$0xff]  ;;  %v364_v14 = vld [vmem:[%s511_s0 + $0x28] sm:$0xff] }
   0x6   :  { %176 = vmatpush.bf16.msra.mxu0 %v373_v1  ;;  %378 = vmatpush.bf16.msra.mxu1 %v373_v1  ;;  %v366_v15 = vld [vmem:[%s511_s0 + $0x38] sm:$0xff] }
   0x7   :  { %379 = vmatpush.bf16.msra.mxu2 %v373_v1  ;;  %380 = vmatpush.bf16.msra.mxu3 %v373_v1 }
   0xa   :  { %177 = vmatpush.bf16.msra.mxu0 %v372_v2  ;;  %381 = vmatpush.bf16.msra.mxu1 %v372_v2 }
   0xb   :  { %382 = vmatpush.bf16.msra.mxu2 %v372_v2  ;;  %383 = vmatpush.bf16.msra.mxu3 %v372_v2 }
   0xe   :  { %178 = vmatpush.bf16.msra.mxu0 %v371_v3  ;;  %384 = vmatpush.bf16.msra.mxu1 %v371_v3 }
   0xf   :  { %385 = vmatpush.bf16.msra.mxu2 %v371_v3  ;;  %386 = vmatpush.bf16.msra.mxu3 %v371_v3 }
  0x12   :  { %179 = vmatpush.bf16.msra.mxu0 %v370_v4  ;;  %387 = vmatpush.bf16.msra.mxu1 %v370_v4 }
  0x13   :  { %388 = vmatpush.bf16.msra.mxu2 %v370_v4  ;;  %389 = vmatpush.bf16.msra.mxu3 %v370_v4 }
  0x16   :  { %180 = vmatpush.bf16.msra.mxu0 %v369_v5  ;;  %390 = vmatpush.bf16.msra.mxu1 %v369_v5 }
  0x17   :  { %391 = vmatpush.bf16.msra.mxu2 %v369_v5  ;;  %392 = vmatpush.bf16.msra.mxu3 %v369_v5 }
  0x1a   :  { %181 = vmatpush.bf16.msra.mxu0 %v368_v6  ;;  %393 = vmatpush.bf16.msra.mxu1 %v368_v6 }
  0x1b   :  { %394 = vmatpush.bf16.msra.mxu2 %v368_v6  ;;  %395 = vmatpush.bf16.msra.mxu3 %v368_v6 }
  0x1e   :  { %182 = vmatpush.bf16.msra.mxu0 %v367_v7  ;;  %396 = vmatpush.bf16.msra.mxu1 %v367_v7 }
  0x1f   :  { %397 = vmatpush.bf16.msra.mxu2 %v367_v7  ;;  %398 = vmatpush.bf16.msra.mxu3 %v367_v7 }
  0x21   :  { %183 = vmatmul.bf16.vlgmr.msra.gmra.mxu0 %v359_v8  ;;  %193 = vmatmul.bf16.vlgmr.msra.gmra.mxu1 %v361_v9 }
  0x22   :  { %203 = vmatmul.bf16.vlgmr.msra.gmra.mxu2 %v363_v10  ;;  %213 = vmatmul.bf16.vlgmr.msra.gmra.mxu3 %v365_v11 }
  0x31   :  { %188 = vmatmul.bf16.gmra.mxu0 %v360_v12  ;;  %198 = vmatmul.bf16.gmra.mxu1 %v362_v13 }
  0x32   :  { %208 = vmatmul.bf16.gmra.mxu2 %v364_v14  ;;  %218 = vmatmul.bf16.gmra.mxu3 %v366_v15 }
  0x9e   :  { %v184_v16 = vpop.f32.mrf.mxu0  ;;  %v194_v17 = vpop.f32.mrf.mxu1 }
  0x9f   :  { %275 = vst [vmem:[%s512_s2] sm:$0xff] %v184_v16 }
  0xa0   :  { %279 = vst [vmem:[%s512_s2 + $0x20] sm:$0xff] %v194_v17 }
  0xa5   :  { %v204_v18 = vpop.f32.mrf.mxu2  ;;  %v214_v19 = vpop.f32.mrf.mxu3 }
  0xa6   :  { %283 = vst [vmem:[%s512_s2 + $0x40] sm:$0xff] %v204_v18  ;;  %v186_v20 = vpop.f32.mrf.mxu0  ;;  %v196_v21 = vpop.f32.mrf.mxu1 }
  0xa7   :  { %287 = vst [vmem:[%s512_s2 + $0x60] sm:$0xff] %v214_v19 }
  0xa8   :  { %276 = vst [vmem:[%s512_s2 + $0x8] sm:$0xff] %v186_v20 }
  0xa9   :  { %280 = vst [vmem:[%s512_s2 + $0x28] sm:$0xff] %v196_v21 }
  0xad   :  { %v206_v22 = vpop.f32.mrf.mxu2  ;;  %v216_v23 = vpop.f32.mrf.mxu3 }
  0xae   :  { %284 = vst [vmem:[%s512_s2 + $0x48] sm:$0xff] %v206_v22  ;;  %v189_v24 = vpop.f32.mrf.mxu0  ;;  %v199_v25 = vpop.f32.mrf.mxu1 }
  0xaf   :  { %288 = vst [vmem:[%s512_s2 + $0x68] sm:$0xff] %v216_v23 }
  0xb0   :  { %277 = vst [vmem:[%s512_s2 + $0x10] sm:$0xff] %v189_v24 }
  0xb1   :  { %281 = vst [vmem:[%s512_s2 + $0x30] sm:$0xff] %v199_v25 }
  0xb5   :  { %v209_v26 = vpop.f32.mrf.mxu2  ;;  %v219_v27 = vpop.f32.mrf.mxu3 }
  0xb6   :  { %285 = vst [vmem:[%s512_s2 + $0x50] sm:$0xff] %v209_v26  ;;  %v191_v28 = vpop.f32.mrf.mxu0  ;;  %v201_v29 = vpop.f32.mrf.mxu1 }
  0xb7   :  { %289 = vst [vmem:[%s512_s2 + $0x70] sm:$0xff] %v219_v27 }
  0xb8   :  { %278 = vst [vmem:[%s512_s2 + $0x18] sm:$0xff] %v191_v28 }
  0xb9   :  { %282 = vst [vmem:[%s512_s2 + $0x38] sm:$0xff] %v201_v29 }
  0xbd   :  { %v211_v30 = vpop.f32.mrf.mxu2  ;;  %v221_v31 = vpop.f32.mrf.mxu3 }
  0xbe   :  { %286 = vst [vmem:[%s512_s2 + $0x58] sm:$0xff] %v211_v30 }
  0xbf   :  { %290 = vst [vmem:[%s512_s2 + $0x78] sm:$0xff] %v221_v31 }

</bundles_post_ra>
